<compile_context>
chip_gen: v6e
topology: v6e:2x2x1
jax: 0.10.0
libtpu: 0.0.40
codegen_flags: <defaults>
</compile_context>

<pallas_src>
import functools

import jax
import jax.numpy as jnp
from jax.experimental import pallas as pl
from jax.experimental.pallas import tpu as pltpu

_INV_SQRT2 = 0.7071067811865476
_LANE = 128


def _round_up(n, m):
    return (n + m - 1) // m * m


def _cdiv(a, b):
    return (a + b - 1) // b


def _gelu(x, approximate):
    if approximate:
        # tanh approximation -> EUP slot, hides under the matmuls.
        return jax.nn.gelu(x, approximate=True)
    # PyTorch nn.GELU() default (exact erf formulation).
    return 0.5 * x * (1.0 + jax.lax.erf(x * _INV_SQRT2))


def _device_kind():
    try:
        return jax.devices()[0].device_kind.lower()
    except Exception:
        return ""


def _vmem_budget_bytes():
    """~3/4 of per-core physical VMEM; generation-aware fallback if get_tpu_info fails."""
    try:
        return int(pltpu.get_tpu_info().vmem_capacity_bytes) * 3 // 4
    except Exception:
        kind = _device_kind()
        if "v7" in kind:
            return 48 * 1024 * 1024   # v7x: 64 MiB per TensorCore
        return 96 * 1024 * 1024       # v5e / v6e: 128 MiB


def _num_tensorcores():
    # v7x has 2 TensorCores per chip; v5e/v6e have 1.
    return 2 if "v7" in _device_kind() else 1


# --------------------------------------------------------------------------------------
# Resident-weights fused kernel: all layers unrolled, one invocation per batch row-tile.
# --------------------------------------------------------------------------------------
def mlp_fused_kernel(x_ref, *refs, approximate_gelu):
    """refs = (w0, b0, w1, b1, ..., w_last, b_last, out_ref). GELU after all but last."""
    out_ref = refs[-1]
    wb_refs = refs[:-1]
    n_layers = len(wb_refs) // 2

    # Feed the MXU in the weights' native dtype (bf16 stays bf16); accumulate in f32.
    h = x_ref[...].astype(wb_refs[0].dtype)
    for li in range(n_layers):
        w = wb_refs[2 * li][...]
        b = wb_refs[2 * li + 1][...]
        h = jnp.dot(h, w, preferred_element_type=jnp.float32) + b.astype(jnp.float32)
        if li < n_layers - 1:
            h = _gelu(h, approximate_gelu)                 # activation math in f32
            h = h.astype(wb_refs[2 * (li + 1)].dtype)      # back to params dtype between layers
    out_ref[...] = h.astype(out_ref.dtype)


# --------------------------------------------------------------------------------------
# Streamed fallback: one tiled (M, N, K) matmul kernel per layer (weights not resident).
# --------------------------------------------------------------------------------------
def _linear_kernel(x_ref, w_ref, b_ref, o_ref, acc_ref, *, apply_gelu, approximate_gelu):
    k = pl.program_id(2)

    @pl.when(k == 0)
    def _():
        acc_ref[...] = jnp.zeros_like(acc_ref)

    acc_ref[...] += jnp.dot(x_ref[...].astype(w_ref.dtype), w_ref[...],
                            preferred_element_type=jnp.float32)

    @pl.when(k == pl.num_programs(2) - 1)
    def _():
        h = acc_ref[...] + b_ref[...].astype(jnp.float32)
        if apply_gelu:
            h = _gelu(h, approximate_gelu)
        o_ref[...] = h.astype(o_ref.dtype)


def _pick_tile(dim, cap):
    """Largest multiple of 128 <= cap that divides dim (dim is already 128-aligned)."""
    t = max(_LANE, min(cap, dim))
    t = (t // _LANE) * _LANE
    while dim % t:
        t -= _LANE
    return t


def _linear_layer(x_p, w_p, b_p, *, tm, apply_gelu, approximate_gelu, out_dtype,
                  vmem_limit_bytes):
    M, K = x_p.shape
    _, N = w_p.shape
    tn = _pick_tile(N, 512)
    tk = _pick_tile(K, 512)
    return pl.pallas_call(
        functools.partial(_linear_kernel, apply_gelu=apply_gelu,
                          approximate_gelu=approximate_gelu),
        out_shape=jax.ShapeDtypeStruct((M, N), out_dtype),
        grid=(M // tm, N // tn, K // tk),
        in_specs=[pl.BlockSpec((tm, tk), lambda i, j, k: (i, k)),
                  pl.BlockSpec((tk, tn), lambda i, j, k: (k, j)),
                  pl.BlockSpec((1, tn), lambda i, j, k: (0, j))],
        out_specs=pl.BlockSpec((tm, tn), lambda i, j, k: (i, j)),
        scratch_shapes=[pltpu.VMEM((tm, tn), jnp.float32)],
        compiler_params=pltpu.CompilerParams(
            dimension_semantics=("parallel", "parallel", "arbitrary"),
            vmem_limit_bytes=vmem_limit_bytes,
        ),
    )(x_p, w_p, b_p)


# --------------------------------------------------------------------------------------
# One-time parameter preparation (hoisted out of the per-call path).
# --------------------------------------------------------------------------------------
def prepare_mlp_params(params):
    """Pad every feature dim to a multiple of 128 (lane-dense); reshape biases to (1, fo).

    params: flat list [w0, b0, w1, b1, ...] with w: [in, out], b: [out] or [1, out].
    Zero padding is inert: GELU(0) = 0 and padded weight rows/cols are zero.
    """
    n_layers = len(params) // 2
    dims = [params[0].shape[0]] + [params[2 * li].shape[1] for li in range(n_layers)]
    pdims = [_round_up(d, _LANE) for d in dims]
    padded = []
    for li in range(n_layers):
        w = params[2 * li]
        b = params[2 * li + 1].reshape(1, -1)
        fi, fo = w.shape
        pi, po = pdims[li], pdims[li + 1]
        if (fi, fo) != (pi, po):
            w = jnp.zeros((pi, po), w.dtype).at[:fi, :fo].set(w)
        if fo != po:
            b = jnp.zeros((1, po), b.dtype).at[:, :fo].set(b)
        padded += [w, b]
    return {"params": padded, "dims": tuple(dims), "pdims": tuple(pdims)}


# --------------------------------------------------------------------------------------
# Forward pass.
# --------------------------------------------------------------------------------------
def mlp_forward(x, prepared, *, tm=512, approximate_gelu=False, out_dtype=None,
                vmem_limit_bytes=None, force_streamed=False):
    """x: [B, input_size]; prepared: output of prepare_mlp_params."""
    params = prepared["params"]
    dims = prepared["dims"]
    pdims = prepared["pdims"]
    n_layers = len(params) // 2
    B, in_dim = x.shape
    assert in_dim == dims[0], "input feature dim mismatch"
    out_dim = dims[-1]
    if out_dtype is None:
        out_dtype = x.dtype
    budget = _vmem_budget_bytes() if vmem_limit_bytes is None else int(vmem_limit_bytes)

    # Sublane grain: 8 rows for f32, 16 for bf16.
    sub = 16 if x.dtype == jnp.bfloat16 else 8

    weights_bytes = sum(int(p.size) * jnp.dtype(p.dtype).itemsize for p in params)
    x_bytes = jnp.dtype(x.dtype).itemsize
    o_bytes = jnp.dtype(out_dtype).itemsize
    max_pad = max(pdims[1:])

    def _resident_fits(tm_rows):
        io = 2 * tm_rows * (pdims[0] * x_bytes + pdims[-1] * o_bytes)   # double-buffered x / out tiles
        scratch = tm_rows * max_pad * 4                                 # live f32 activation intermediate
        return weights_bytes + io + scratch <= budget

    # ---- choose row tile: budget-derived, then snapped to a near-divisor of the batch ----
    tm_fit = _round_up(min(tm, _round_up(B, sub)), sub)
    use_resident = not force_streamed
    if use_resident:
        while tm_fit > sub and not _resident_fits(tm_fit):
            tm_fit = max(sub, _round_up(tm_fit // 2, sub))
        if not _resident_fits(tm_fit):
            use_resident = False   # weights alone overflow VMEM (v7x-sized configs) -> stream
    if not use_resident:
        tm_fit = _round_up(min(tm, _round_up(B, sub)), sub)

    n_tiles = _cdiv(B, tm_fit)
    if _num_tensorcores() >= 2 and n_tiles == 1 and _round_up(B, sub) >= 2 * sub:
        n_tiles = 2   # give both v7x TensorCores a batch tile under ("parallel",)
    tm_eff = _round_up(_cdiv(B, n_tiles), sub)
    B_pad = tm_eff * n_tiles

    # ---- input padding (skipped entirely when nothing to pad) ----
    if B_pad == B and in_dim == pdims[0]:
        x_p = x
    else:
        x_p = jnp.zeros((B_pad, pdims[0]), x.dtype).at[:B, :in_dim].set(x)

    if use_resident:
        in_specs = [pl.BlockSpec((tm_eff, pdims[0]), lambda i: (i, 0))]
        for li in range(n_layers):
            w_p = params[2 * li]
            b_p = params[2 * li + 1]
            # Block index is constant across the grid -> single-buffer the resident params.
            in_specs.append(pl.BlockSpec(w_p.shape, lambda i: (0, 0),
                                         pipeline_mode=pl.Buffered(buffer_count=1)))
            in_specs.append(pl.BlockSpec(b_p.shape, lambda i: (0, 0),
                                         pipeline_mode=pl.Buffered(buffer_count=1)))
        out_p = pl.pallas_call(
            functools.partial(mlp_fused_kernel, approximate_gelu=approximate_gelu),
            out_shape=jax.ShapeDtypeStruct((B_pad, pdims[-1]), out_dtype),
            grid=(n_tiles,),
            in_specs=in_specs,
            out_specs=pl.BlockSpec((tm_eff, pdims[-1]), lambda i: (i, 0)),
            compiler_params=pltpu.CompilerParams(
                dimension_semantics=("parallel",),
                vmem_limit_bytes=budget,
            ),
        )(x_p, *params)
    else:
        # Streamed fallback: weights are not VMEM-resident; one tiled matmul per layer,
        # bias + GELU fused into the K-reduction epilogue.
        h = x_p
        for li in range(n_layers):
            last = li == n_layers - 1
            layer_out_dtype = out_dtype if last else params[2 * (li + 1)].dtype
            h = _linear_layer(h, params[2 * li], params[2 * li + 1],
                              tm=tm_eff, apply_gelu=not last,
                              approximate_gelu=approximate_gelu,
                              out_dtype=layer_out_dtype,
                              vmem_limit_bytes=budget)
        out_p = h

    return out_p[:B, :out_dim]


# --------------------------------------------------------------------------------------
# Init + reference (match the PyTorch module: normal(std=1e-3) weights, zero biases).
# --------------------------------------------------------------------------------------
def init_mlp_params(key, input_size, output_size, hidden_size=64, hidden_layers=1,
                    dtype=jnp.float32):
    sizes = [input_size] + [hidden_size] * hidden_layers + [output_size]
    params = []
    for fan_in, fan_out in zip(sizes[:-1], sizes[1:]):
        key, sub = jax.random.split(key)
        w = (jax.random.normal(sub, (fan_in, fan_out), dtype=jnp.float32) * 1e-3).astype(dtype)
        b = jnp.zeros((1, fan_out), dtype=dtype)
        params += [w, b]
    return params


def mlp_reference(x, params):
    h = x.astype(jnp.float32)
    n_layers = len(params) // 2
    for li in range(n_layers):
        h = h @ params[2 * li].astype(jnp.float32) + params[2 * li + 1].astype(jnp.float32).reshape(1, -1)
        if li < n_layers - 1:
            h = _gelu(h, approximate=False)
    return h.astype(x.dtype)


if __name__ == "__main__":
    key = jax.random.PRNGKey(0)

    batch, input_size, hidden_size, output_size = 16, 16, 32, 8
    hidden_layers = 2  # => input layer + 1 hidden layer + output layer

    kx, kp = jax.random.split(key)
    x = jax.random.normal(kx, (batch, input_size), dtype=jnp.float32)
    params = init_mlp_params(kp, input_size, output_size,
                             hidden_size=hidden_size, hidden_layers=hidden_layers)

    prepared = prepare_mlp_params(params)   # one-time padding, hoisted out of the call path
    ref = mlp_reference(x, params)

    # Resident-weights fused path.
    out = jax.block_until_ready(mlp_forward(x, prepared))
    assert out.shape == (batch, output_size)
    assert jnp.allclose(out, ref, atol=1e-5, rtol=1e-5), "resident path mismatch vs reference"

    # Streamed per-layer fallback (used automatically when resident weights overflow VMEM).
    out_s = jax.block_until_ready(mlp_forward(x, prepared, force_streamed=True))
    assert jnp.allclose(out_s, ref, atol=1e-5, rtol=1e-5), "streamed path mismatch vs reference"

    print("KERNEL_OK")
</pallas_src>

<mosaic_0001>
module attributes {stable_mosaic.version = 11 : i64} {
  func.func @mlp_fused_kernel(%arg0: i32, %arg1: memref<16x128xf32, #tpu.memory_space<vmem>>, %arg2: memref<128x128xf32, #tpu.memory_space<vmem>>, %arg3: memref<1x128xf32, #tpu.memory_space<vmem>>, %arg4: memref<128x128xf32, #tpu.memory_space<vmem>>, %arg5: memref<1x128xf32, #tpu.memory_space<vmem>>, %arg6: memref<128x128xf32, #tpu.memory_space<vmem>>, %arg7: memref<1x128xf32, #tpu.memory_space<vmem>>, %arg8: memref<16x128xf32, #tpu.memory_space<vmem>>) attributes {dimension_semantics = [#tpu.dimension_semantics<parallel>], iteration_bounds = array<i64: 1>, scalar_prefetch = 0 : i64, scratch_operands = 0 : i64, tpu.core_type = #tpu.core_type<tc>, window_params = [{transform_indices = @transform_0, window_bounds = array<i64: 16, 128>}, {pipeline_mode = #tpu.pipeline_mode<synchronous>, transform_indices = @transform_1, window_bounds = array<i64: 128, 128>}, {pipeline_mode = #tpu.pipeline_mode<synchronous>, transform_indices = @transform_2, window_bounds = array<i64: 1, 128>}, {pipeline_mode = #tpu.pipeline_mode<synchronous>, transform_indices = @transform_3, window_bounds = array<i64: 128, 128>}, {pipeline_mode = #tpu.pipeline_mode<synchronous>, transform_indices = @transform_4, window_bounds = array<i64: 1, 128>}, {pipeline_mode = #tpu.pipeline_mode<synchronous>, transform_indices = @transform_5, window_bounds = array<i64: 128, 128>}, {pipeline_mode = #tpu.pipeline_mode<synchronous>, transform_indices = @transform_6, window_bounds = array<i64: 1, 128>}, {transform_indices = @transform_7, window_bounds = array<i64: 16, 128>}]} {
    %c0 = arith.constant 0 : index
    %c0_0 = arith.constant 0 : index
    %0 = vector.load %arg1[%c0, %c0_0] : memref<16x128xf32, #tpu.memory_space<vmem>>, vector<16x128xf32>
    %c0_1 = arith.constant 0 : index
    %c0_2 = arith.constant 0 : index
    %1 = vector.load %arg2[%c0_1, %c0_2] : memref<128x128xf32, #tpu.memory_space<vmem>>, vector<128x128xf32>
    %c0_3 = arith.constant 0 : index
    %c0_4 = arith.constant 0 : index
    %2 = vector.load %arg3[%c0_3, %c0_4] : memref<1x128xf32, #tpu.memory_space<vmem>>, vector<1x128xf32>
    %cst = arith.constant dense<0.000000e+00> : vector<16x128xf32>
    %3 = tpu.matmul %0, %1, %cst {dimension_numbers = #tpu.dot_dimension_numbers<[1], [0], [0], [1], [0, 0, 1, 1], [], []>} : vector<16x128xf32>, vector<128x128xf32>, vector<16x128xf32> -> vector<16x128xf32>
    %4 = vector.broadcast %2 : vector<1x128xf32> to vector<16x128xf32>
    %5 = arith.addf %3, %4 : vector<16x128xf32>
    %cst_5 = arith.constant 5.000000e-01 : f32
    %6 = vector.broadcast %cst_5 : f32 to vector<16x128xf32>
    %7 = arith.mulf %6, %5 : vector<16x128xf32>
    %cst_6 = arith.constant 0.707106769 : f32
    %8 = vector.broadcast %cst_6 : f32 to vector<16x128xf32>
    %9 = arith.mulf %5, %8 : vector<16x128xf32>
    %10 = math.erf %9 : vector<16x128xf32>
    %cst_7 = arith.constant 1.000000e+00 : f32
    %11 = vector.broadcast %cst_7 : f32 to vector<16x128xf32>
    %12 = arith.addf %11, %10 : vector<16x128xf32>
    %13 = arith.mulf %7, %12 : vector<16x128xf32>
    %c0_8 = arith.constant 0 : index
    %c0_9 = arith.constant 0 : index
    %14 = vector.load %arg4[%c0_8, %c0_9] : memref<128x128xf32, #tpu.memory_space<vmem>>, vector<128x128xf32>
    %c0_10 = arith.constant 0 : index
    %c0_11 = arith.constant 0 : index
    %15 = vector.load %arg5[%c0_10, %c0_11] : memref<1x128xf32, #tpu.memory_space<vmem>>, vector<1x128xf32>
    %cst_12 = arith.constant dense<0.000000e+00> : vector<16x128xf32>
    %16 = tpu.matmul %13, %14, %cst_12 {dimension_numbers = #tpu.dot_dimension_numbers<[1], [0], [0], [1], [0, 0, 1, 1], [], []>} : vector<16x128xf32>, vector<128x128xf32>, vector<16x128xf32> -> vector<16x128xf32>
    %17 = vector.broadcast %15 : vector<1x128xf32> to vector<16x128xf32>
    %18 = arith.addf %16, %17 : vector<16x128xf32>
    %cst_13 = arith.constant 5.000000e-01 : f32
    %19 = vector.broadcast %cst_13 : f32 to vector<16x128xf32>
    %20 = arith.mulf %19, %18 : vector<16x128xf32>
    %cst_14 = arith.constant 0.707106769 : f32
    %21 = vector.broadcast %cst_14 : f32 to vector<16x128xf32>
    %22 = arith.mulf %18, %21 : vector<16x128xf32>
    %23 = math.erf %22 : vector<16x128xf32>
    %cst_15 = arith.constant 1.000000e+00 : f32
    %24 = vector.broadcast %cst_15 : f32 to vector<16x128xf32>
    %25 = arith.addf %24, %23 : vector<16x128xf32>
    %26 = arith.mulf %20, %25 : vector<16x128xf32>
    %c0_16 = arith.constant 0 : index
    %c0_17 = arith.constant 0 : index
    %27 = vector.load %arg6[%c0_16, %c0_17] : memref<128x128xf32, #tpu.memory_space<vmem>>, vector<128x128xf32>
    %c0_18 = arith.constant 0 : index
    %c0_19 = arith.constant 0 : index
    %28 = vector.load %arg7[%c0_18, %c0_19] : memref<1x128xf32, #tpu.memory_space<vmem>>, vector<1x128xf32>
    %cst_20 = arith.constant dense<0.000000e+00> : vector<16x128xf32>
    %29 = tpu.matmul %26, %27, %cst_20 {dimension_numbers = #tpu.dot_dimension_numbers<[1], [0], [0], [1], [0, 0, 1, 1], [], []>} : vector<16x128xf32>, vector<128x128xf32>, vector<16x128xf32> -> vector<16x128xf32>
    %30 = vector.broadcast %28 : vector<1x128xf32> to vector<16x128xf32>
    %31 = arith.addf %29, %30 : vector<16x128xf32>
    %c0_21 = arith.constant 0 : index
    %c0_22 = arith.constant 0 : index
    %32 = vector.load %arg8[%c0_21, %c0_22] : memref<16x128xf32, #tpu.memory_space<vmem>>, vector<16x128xf32>
    tpu.vector_store %arg8[%c0_21, %c0_22], %31 {strides = array<i32>} : memref<16x128xf32, #tpu.memory_space<vmem>>, vector<16x128xf32>,
    return
  }
  func.func @transform_0(%arg0: i32) -> (i32, i32) {
    %c0_i32 = arith.constant 0 : i32
    %c0_i32_0 = arith.constant 0 : i32
    return %arg0, %c0_i32 : i32, i32
  }
  func.func @transform_1(%arg0: i32) -> (i32, i32) {
    %c0_i32 = arith.constant 0 : i32
    %c0_i32_0 = arith.constant 0 : i32
    %c0_i32_1 = arith.constant 0 : i32
    return %c0_i32, %c0_i32_0 : i32, i32
  }
  func.func @transform_2(%arg0: i32) -> (i32, i32) {
    %c0_i32 = arith.constant 0 : i32
    %c0_i32_0 = arith.constant 0 : i32
    %c0_i32_1 = arith.constant 0 : i32
    return %c0_i32, %c0_i32_0 : i32, i32
  }
  func.func @transform_3(%arg0: i32) -> (i32, i32) {
    %c0_i32 = arith.constant 0 : i32
    %c0_i32_0 = arith.constant 0 : i32
    %c0_i32_1 = arith.constant 0 : i32
    return %c0_i32, %c0_i32_0 : i32, i32
  }
  func.func @transform_4(%arg0: i32) -> (i32, i32) {
    %c0_i32 = arith.constant 0 : i32
    %c0_i32_0 = arith.constant 0 : i32
    %c0_i32_1 = arith.constant 0 : i32
    return %c0_i32, %c0_i32_0 : i32, i32
  }
  func.func @transform_5(%arg0: i32) -> (i32, i32) {
    %c0_i32 = arith.constant 0 : i32
    %c0_i32_0 = arith.constant 0 : i32
    %c0_i32_1 = arith.constant 0 : i32
    return %c0_i32, %c0_i32_0 : i32, i32
  }
  func.func @transform_6(%arg0: i32) -> (i32, i32) {
    %c0_i32 = arith.constant 0 : i32
    %c0_i32_0 = arith.constant 0 : i32
    %c0_i32_1 = arith.constant 0 : i32
    return %c0_i32, %c0_i32_0 : i32, i32
  }
  func.func @transform_7(%arg0: i32) -> (i32, i32) {
    %c0_i32 = arith.constant 0 : i32
    %c0_i32_0 = arith.constant 0 : i32
    return %arg0, %c0_i32 : i32, i32
  }
}

</mosaic_0001>

<bundles_post_ra>
// kernel: tpu_custom_call.1
= control target key start
LH: loop header
LB: loop body
LE: loop exit
PB: predicated region body
PF: predicated region fallthrough
CT: control target
= control target key end

     0   :  { %12 = vsyncpa [#allocation3], 0  ;;  %s790_s0 = inlined_call_operand.hbm [shape: f32[16,128], index: 0, kind: input, shape index: {}]   ;;  %s791_s1 = inlined_call_operand.hbm [shape: f32[128,128], index: 1, kind: input, shape index: {}]   ;;  %s792_s2 = inlined_call_operand.vmem [shape: f32[1,128], index: 2, kind: input, shape index: {}]   ;;  %s793_s3 = inlined_call_operand.hbm [shape: f32[128,128], index: 3, kind: input, shape index: {}]   ;;  %s794_s4 = inlined_call_operand.vmem [shape: f32[1,128], index: 4, kind: input, shape index: {}]   ;;  %s795_s5 = inlined_call_operand.hbm [shape: f32[128,128], index: 5, kind: input, shape index: {}]   ;;  %s796_s6 = inlined_call_operand.vmem [shape: f32[1,128], index: 6, kind: input, shape index: {}]   ;;  %s797_s7 = inlined_call_operand.hbm [shape: f32[16,128], index: 7, kind: output, shape index: {}]  }
   0x1   :  { %13 = vsyncpa [#allocation6], 0 }
   0x2   :  { %14 = vsyncpa [#allocation9], 0 }
   0x3   :  { %15 = vsyncpa [#allocation4], 0  ;;  %s704_s24 = smov [#allocation5]   ;;  %s705_s26 = smov [#allocation2]  }
   0x4   :  { %s33_s25 = sshll.u32 %s704_s24, 4  ;;  %s21_s27 = sshll.u32 %s705_s26, 4  ;;  %s34_s25 = int_to_ptr.vmem [resolvable:$true] %s33_s25  ;;  %s22_s27 = int_to_ptr.vmem [resolvable:$true] %s21_s27 }
   0x5   :  { %s604_s28 = scalar_lea.vmem %s34_s25, 2048  ;;  %p609_p1 = scmp.lt.s32.totalorder %s34_s25, %s34_s25 }
   0x6   :  { %p605_p0 = scmp.ne.s32.totalorder %s34_s25, %s604_s28  ;;  %p610_p2 = scmp.lt.s32.totalorder %s604_s28, %s604_s28 }
   0x8   :  { %p611_p3 = por %p610_p2, %p609_p1 }
   0xa   :  { %p612_p4 = pnand %p611_p3, %p605_p0 }
   0xc   :  { %615 = shalt.err (!%p612_p4)
}
   0xd   :  { %s706_s29 = smov 128   ;;  %s707_s30 = smov 8  }
   0xe   :  { %39 = dma.hbm_to_vmem [thread:$0]  %s791_s1, 2048, %s34_s25, [#allocation6], %s706_s29, %s706_s29, %s707_s30  }
   0xf   :  { %s624_s10 = scalar_lea.vmem %s22_s27, 256  ;;  %p629_p6 = scmp.lt.s32.totalorder %s22_s27, %s22_s27 }
  0x10   :  { %p625_p5 = scmp.ne.s32.totalorder %s22_s27, %s624_s10  ;;  %p630_p7 = scmp.lt.s32.totalorder %s624_s10, %s624_s10 }
  0x12   :  { %p631_p8 = por %p630_p7, %p629_p6 }
  0x14   :  { %p632_p9 = pnand %p631_p8, %p625_p5 }
  0x16   :  { %635 = shalt.err (!%p632_p9)
}
  0x17   :  { %27 = dma.hbm_to_vmem [thread:$0]  %s790_s0, 256, %s22_s27, [#allocation3], %s706_s29, %s706_s29, %s707_s30  }
  0x18   :  { %s708_s13 = smov [#allocation7]   ;;  %s709_s15 = smov [#allocation8]  }
  0x19   :  { %s47_s14 = sshll.u32 %s708_s13, 4  ;;  %s61_s16 = sshll.u32 %s709_s15, 4  ;;  %s48_s14 = int_to_ptr.vmem [resolvable:$true] %s47_s14  ;;  %s62_s16 = int_to_ptr.vmem [resolvable:$true] %s61_s16 }
  0x1a   :  { %s644_s1 = scalar_lea.vmem %s48_s14, 2048  ;;  %p649_p11 = scmp.lt.s32.totalorder %s48_s14, %s48_s14 }
  0x1b   :  { %p645_p10 = scmp.ne.s32.totalorder %s48_s14, %s644_s1  ;;  %p650_p12 = scmp.lt.s32.totalorder %s644_s1, %s644_s1 }
  0x1d   :  { %p651_p13 = por %p650_p12, %p649_p11 }
  0x1f   :  { %p652_p0 = pnand %p651_p13, %p645_p10 }
  0x21   :  { %655 = shalt.err (!%p652_p0)
}
  0x22   :  { %53 = dma.hbm_to_vmem [thread:$0]  %s793_s3, 2048, %s48_s14, [#allocation6], %s706_s29, %s706_s29, %s707_s30  }
  0x23   :  { %s664_s0 = scalar_lea.vmem %s62_s16, 2048  ;;  %p669_p2 = scmp.lt.s32.totalorder %s62_s16, %s62_s16 }
  0x24   :  { %p665_p1 = scmp.ne.s32.totalorder %s62_s16, %s664_s0  ;;  %p670_p3 = scmp.lt.s32.totalorder %s664_s0, %s664_s0 }
  0x26   :  { %p671_p4 = por %p670_p3, %p669_p2 }
  0x28   :  { %p672_p5 = pnand %p671_p4, %p665_p1 }
  0x2a   :  { %675 = shalt.err (!%p672_p5)
}
  0x2b   :  { %67 = dma.hbm_to_vmem [thread:$0]  %s795_s5, 2048, %s62_s16, [#allocation9], %s706_s29, %s706_s29, %s707_s30  }
  0x2c   :  { %696 = dma.done.wait [#allocation3], 256  }
  0x2d   :  { %697 = vsyncadd [#allocation3], 4294967040 }
  0x2e   :  { %698 = dma.done.wait [#allocation6], 4096  }
  0x2f   :  { %699 = vsyncadd [#allocation6], 4294963200 }
  0x30   :  { %700 = dma.done.wait [#allocation9], 2048  }
  0x31   :  { %701 = vsyncadd [#allocation9], 4294965248  ;;  %v99_v0 = vld [vmem:[#allocation5 + $0x78] sm:$0xff]  ;;  %v98_v1 = vld [vmem:[#allocation5 + $0x70] sm:$0xff]  ;;  %s710_s23 = smov [#allocation10]  }
  0x32   :  { %476 = vmatprep.subr.mxu0 %v99_v0  ;;  %v97_v2 = vld [vmem:[#allocation5 + $0x68] sm:$0xff]  ;;  %v96_v3 = vld [vmem:[#allocation5 + $0x60] sm:$0xff]  ;;  %v82_v4 = vld [vmem:[#allocation2] sm:$0xff]  ;;  %s405_s24 = sshll.u32 %s710_s23, 4  ;;  %s406_s24 = int_to_ptr.vmem [resolvable:$true] %s405_s24 }
  0x33   :  { %477 = vmatpush3.msra.mxu0 %v99_v0  ;;  %v95_v5 = vld [vmem:[#allocation5 + $0x58] sm:$0xff]  ;;  %508 = vmatprep.mubr.f32.mxu0 %v82_v4  ;;  %v206_v7 = vld [vmem:[#allocation7 + $0x70] sm:$0xff]  ;;  %v205_v9 = vld [vmem:[#allocation7 + $0x68] sm:$0xff]  ;;  %s676_s25 = scalar_lea.vmem %s406_s24, 256  ;;  %p681_p7 = scmp.lt.s32.totalorder %s406_s24, %s406_s24 }
  0x34   :  { %478 = vmatprep.subr.mxu0 %v98_v1  ;;  %v207_v6 = vld [vmem:[#allocation7 + $0x78] sm:$0xff]  ;;  %v94_v8 = vld [vmem:[#allocation5 + $0x50] sm:$0xff]  ;;  %v93_v10 = vld [vmem:[#allocation5 + $0x48] sm:$0xff]  ;;  %p677_p6 = scmp.ne.s32.totalorder %s406_s24, %s676_s25  ;;  %p682_p8 = scmp.lt.s32.totalorder %s676_s25, %s676_s25 }
  0x35   :  { %479 = vmatpush3.msra.mxu0 %v98_v1  ;;  %511 = vmatprep.subr.mxu1 %v207_v6  ;;  %v92_v11 = vld [vmem:[#allocation5 + $0x40] sm:$0xff]  ;;  %v91_v12 = vld [vmem:[#allocation5 + $0x38] sm:$0xff]  ;;  %v90_v13 = vld [vmem:[#allocation5 + $0x30] sm:$0xff] }
  0x36   :  { %480 = vmatprep.subr.mxu0 %v97_v2  ;;  %512 = vmatpush3.msra.mxu1 %v207_v6  ;;  %v89_v14 = vld [vmem:[#allocation5 + $0x28] sm:$0xff]  ;;  %v88_v15 = vld [vmem:[#allocation5 + $0x20] sm:$0xff]  ;;  %v87_v16 = vld [vmem:[#allocation5 + $0x18] sm:$0xff]  ;;  %p683_p9 = por %p682_p8, %p681_p7 }
  0x37   :  { %481 = vmatpush3.msra.mxu0 %v97_v2  ;;  %513 = vmatprep.subr.mxu1 %v206_v7  ;;  %v86_v17 = vld [vmem:[#allocation5 + $0x10] sm:$0xff]  ;;  %v85_v18 = vld [vmem:[#allocation5 + $0x8] sm:$0xff]  ;;  %v84_v19 = vld [vmem:[#allocation5] sm:$0xff] }
  0x38   :  { %482 = vmatprep.subr.mxu0 %v96_v3  ;;  %514 = vmatpush3.msra.mxu1 %v206_v7  ;;  %v83_v20 = vld [vmem:[#allocation2 + $0x8] sm:$0xff]  ;;  %v204_v21 = vld [vmem:[#allocation7 + $0x60] sm:$0xff]  ;;  %v202_v23 = vld [vmem:[#allocation7 + $0x50] sm:$0xff]  ;;  %p684_p10 = pnand %p683_p9, %p677_p6 }
  0x39   :  { %483 = vmatpush3.msra.mxu0 %v96_v3  ;;  %515 = vmatprep.subr.mxu1 %v205_v9  ;;  %v203_v22 = vld [vmem:[#allocation7 + $0x58] sm:$0xff]  ;;  %v201_v24 = vld [vmem:[#allocation7 + $0x48] sm:$0xff]  ;;  %v200_v25 = vld [vmem:[#allocation7 + $0x40] sm:$0xff] }
  0x3a   :  { %484 = vmatprep.subr.mxu0 %v95_v5  ;;  %516 = vmatpush3.msra.mxu1 %v205_v9  ;;  %v199_v26 = vld [vmem:[#allocation7 + $0x38] sm:$0xff]  ;;  %v198_v27 = vld [vmem:[#allocation7 + $0x30] sm:$0xff]  ;;  %v197_v28 = vld [vmem:[#allocation7 + $0x28] sm:$0xff] }
  0x3b   :  { %485 = vmatpush3.msra.mxu0 %v95_v5  ;;  %517 = vmatprep.subr.mxu1 %v204_v21  ;;  %v196_v29 = vld [vmem:[#allocation7 + $0x20] sm:$0xff]  ;;  %v195_v30 = vld [vmem:[#allocation7 + $0x18] sm:$0xff]  ;;  %v194_v31 = vld [vmem:[#allocation7 + $0x10] sm:$0xff] }
  0x3c   :  { %486 = vmatprep.subr.mxu0 %v94_v8  ;;  %518 = vmatpush3.msra.mxu1 %v204_v21  ;;  %v193_v32 = vld [vmem:[#allocation7 + $0x8] sm:$0xff]  ;;  %v192_v33 = vld [vmem:[#allocation7] sm:$0xff]  ;;  %v315_v34 = vld [vmem:[#allocation8 + $0x78] sm:$0xff] }
  0x3d   :  { %487 = vmatpush3.msra.mxu0 %v94_v8  ;;  %519 = vmatprep.subr.mxu1 %v203_v22  ;;  %v314_v35 = vld [vmem:[#allocation8 + $0x70] sm:$0xff]  ;;  %v313_v36 = vld [vmem:[#allocation8 + $0x68] sm:$0xff]  ;;  %v312_v52 = vld [vmem:[#allocation8 + $0x60] sm:$0xff] }
  0x3e   :  { %488 = vmatprep.subr.mxu0 %v93_v10  ;;  %520 = vmatpush3.msra.mxu1 %v203_v22  ;;  %v419_v37 = vld [vmem:[%s792_s2] ss:$0 sm:$0xff]  ;;  %v311_v53 = vld [vmem:[#allocation8 + $0x58] sm:$0xff]  ;;  %v309_v55 = vld [vmem:[#allocation8 + $0x48] sm:$0xff] }
  0x3f   :  { %489 = vmatpush3.msra.mxu0 %v93_v10  ;;  %521 = vmatprep.subr.mxu1 %v202_v23  ;;  %v310_v54 = vld [vmem:[#allocation8 + $0x50] sm:$0xff]  ;;  %v308_v56 = vld [vmem:[#allocation8 + $0x40] sm:$0xff]  ;;  %v307_v57 = vld [vmem:[#allocation8 + $0x38] sm:$0xff] }
  0x40   :  { %490 = vmatprep.subr.mxu0 %v92_v11  ;;  %522 = vmatpush3.msra.mxu1 %v202_v23  ;;  %v306_v58 = vld [vmem:[#allocation8 + $0x30] sm:$0xff]  ;;  %v305_v59 = vld [vmem:[#allocation8 + $0x28] sm:$0xff]  ;;  %v304_v60 = vld [vmem:[#allocation8 + $0x20] sm:$0xff] }
  0x41   :  { %491 = vmatpush3.msra.mxu0 %v92_v11  ;;  %523 = vmatprep.subr.mxu1 %v201_v24  ;;  %v303_v61 = vld [vmem:[#allocation8 + $0x18] sm:$0xff]  ;;  %v302_v62 = vld [vmem:[#allocation8 + $0x10] sm:$0xff]  ;;  %v301_v63 = vld [vmem:[#allocation8 + $0x8] sm:$0xff] }
  0x42   :  { %492 = vmatprep.subr.mxu0 %v91_v12  ;;  %524 = vmatpush3.msra.mxu1 %v201_v24  ;;  %v300_v0 = vld [vmem:[#allocation8] sm:$0xff]  ;;  %v420_v1 = vld [vmem:[%s794_s4] ss:$0 sm:$0xff] }
  0x43   :  { %493 = vmatpush3.msra.mxu0 %v91_v12  ;;  %525 = vmatprep.subr.mxu1 %v200_v25 }
  0x44   :  { %494 = vmatprep.subr.mxu0 %v90_v13  ;;  %526 = vmatpush3.msra.mxu1 %v200_v25 }
  0x45   :  { %495 = vmatpush3.msra.mxu0 %v90_v13  ;;  %527 = vmatprep.subr.mxu1 %v199_v26 }
  0x46   :  { %496 = vmatprep.subr.mxu0 %v89_v14  ;;  %528 = vmatpush3.msra.mxu1 %v199_v26 }
  0x47   :  { %497 = vmatpush3.msra.mxu0 %v89_v14  ;;  %529 = vmatprep.subr.mxu1 %v198_v27 }
  0x48   :  { %498 = vmatprep.subr.mxu0 %v88_v15  ;;  %530 = vmatpush3.msra.mxu1 %v198_v27 }
  0x49   :  { %499 = vmatpush3.msra.mxu0 %v88_v15  ;;  %531 = vmatprep.subr.mxu1 %v197_v28 }
  0x4a   :  { %500 = vmatprep.subr.mxu0 %v87_v16  ;;  %532 = vmatpush3.msra.mxu1 %v197_v28 }
  0x4b   :  { %501 = vmatpush3.msra.mxu0 %v87_v16  ;;  %533 = vmatprep.subr.mxu1 %v196_v29  ;;  %v421_v16 = vld [vmem:[%s796_s6] ss:$0 sm:$0xff] }
  0x4c   :  { %502 = vmatprep.subr.mxu0 %v86_v17  ;;  %534 = vmatpush3.msra.mxu1 %v196_v29 }
  0x4d   :  { %503 = vmatpush3.msra.mxu0 %v86_v17  ;;  %535 = vmatprep.subr.mxu1 %v195_v30 }
  0x4e   :  { %504 = vmatprep.subr.mxu0 %v85_v18  ;;  %536 = vmatpush3.msra.mxu1 %v195_v30 }
  0x4f   :  { %505 = vmatpush3.msra.mxu0 %v85_v18  ;;  %537 = vmatprep.subr.mxu1 %v194_v31 }
  0x50   :  { %506 = vmatprep.subr.mxu0 %v84_v19  ;;  %538 = vmatpush3.msra.mxu1 %v194_v31 }
  0x51   :  { %507 = vmatpush3.msra.mxu0 %v84_v19  ;;  %539 = vmatprep.subr.mxu1 %v193_v32 }
  0x52   :  { %509 = vmatmul.mubr.f32.vlgmr.msra.gmra.mxu0 %v83_v20  ;;  %540 = vmatpush3.msra.mxu1 %v193_v32 }
  0x53   :  { %541 = vmatprep.subr.mxu1 %v192_v33  ;;  %546 = vmatprep.subr.mxu0 %v315_v34 }
  0x54   :  { %542 = vmatpush3.msra.mxu1 %v192_v33  ;;  %547 = vmatpush3.msra.mxu0 %v315_v34 }
  0x55   :  { %548 = vmatprep.subr.mxu0 %v314_v35 }
  0x56   :  { %549 = vmatpush3.msra.mxu0 %v314_v35 }
  0x57   :  { %550 = vmatprep.subr.mxu0 %v313_v36 }
  0x58   :  { %551 = vmatpush3.msra.mxu0 %v313_v36 }
  0x59   :  { %552 = vmatprep.subr.mxu0 %v312_v52 }
  0x5a   :  { %553 = vmatpush3.msra.mxu0 %v312_v52 }
  0x5b   :  { %554 = vmatprep.subr.mxu0 %v311_v53 }
  0x5c   :  { %555 = vmatpush3.msra.mxu0 %v311_v53 }
  0x5d   :  { %556 = vmatprep.subr.mxu0 %v310_v54 }
  0x5e   :  { %557 = vmatpush3.msra.mxu0 %v310_v54 }
  0x5f   :  { %558 = vmatprep.subr.mxu0 %v309_v55 }
  0x60   :  { %559 = vmatpush3.msra.mxu0 %v309_v55 }
  0x61   :  { %560 = vmatprep.subr.mxu0 %v308_v56 }
  0x62   :  { %561 = vmatpush3.msra.mxu0 %v308_v56 }
  0x63   :  { %562 = vmatprep.subr.mxu0 %v307_v57 }
  0x64   :  { %563 = vmatpush3.msra.mxu0 %v307_v57 }
  0x65   :  { %564 = vmatprep.subr.mxu0 %v306_v58 }
  0x66   :  { %565 = vmatpush3.msra.mxu0 %v306_v58 }
  0x67   :  { %566 = vmatprep.subr.mxu0 %v305_v59 }
  0x68   :  { %567 = vmatpush3.msra.mxu0 %v305_v59 }
  0x69   :  { %568 = vmatprep.subr.mxu0 %v304_v60 }
  0x6a   :  { %569 = vmatpush3.msra.mxu0 %v304_v60 }
  0x6b   :  { %570 = vmatprep.subr.mxu0 %v303_v61 }
  0x6c   :  { %571 = vmatpush3.msra.mxu0 %v303_v61 }
  0x6d   :  { %572 = vmatprep.subr.mxu0 %v302_v62 }
  0x6e   :  { %573 = vmatpush3.msra.mxu0 %v302_v62 }
  0x6f   :  { %574 = vmatprep.subr.mxu0 %v301_v63 }
  0x70   :  { %575 = vmatpush3.msra.mxu0 %v301_v63 }
  0x71   :  { %576 = vmatprep.subr.mxu0 %v300_v0 }
  0x72   :  { %577 = vmatpush3.msra.mxu0 %v300_v0 }
 0x112   :  { %v510_v38 = vpop.f32.mrf.mxu0 }
 0x113   :  { %v179_v39 = vadd.f32 %v510_v38, %v419_v37 }
 0x114   :  { %v173_v40 = vpop.f32.mrf.mxu0 }
 0x115   :  { %v185_v41 = vmul.f32 0.70710677, %v179_v39  ;;  %v174_v42 = vadd.f32 %v419_v37, %v173_v40  ;;  %v183_v49 = vmul.f32 0.5, %v179_v39 }
 0x117   :  { %588 = verf.f32 %v185_v41  ;;  %v184_v43 = vmul.f32 0.70710677, %v174_v42  ;;  %v182_v47 = vmul.f32 0.5, %v174_v42 }
 0x119   :  { %590 = verf.f32 %v184_v43 }
 0x124   :  { %v589_v44 = vpop.eup %588 }
 0x125   :  { %v189_v46 = vadd.f32 1.0, %v589_v44 }
 0x126   :  { %v591_v45 = vpop.eup %590 }
 0x127   :  { %v188_v48 = vadd.f32 1.0, %v591_v45  ;;  %v191_v51 = vmul.f32 %v189_v46, %v183_v49 }
 0x129   :  { %v190_v50 = vmul.f32 %v188_v48, %v182_v47 }
 0x12b   :  { %543 = vmatprep.mubr.f32.mxu1 %v190_v50 }
 0x12c   :  { %544 = vmatmul.mubr.f32.vlgmr.msra.gmra.mxu1 %v191_v51 }
 0x1ec   :  { %v545_v2 = vpop.f32.mrf.mxu1 }
 0x1ed   :  { %v287_v3 = vadd.f32 %v545_v2, %v420_v1 }
 0x1ee   :  { %v281_v4 = vpop.f32.mrf.mxu1 }
 0x1ef   :  { %v293_v5 = vmul.f32 0.70710677, %v287_v3  ;;  %v282_v6 = vadd.f32 %v420_v1, %v281_v4  ;;  %v291_v13 = vmul.f32 0.5, %v287_v3 }
 0x1f1   :  { %592 = verf.f32 %v293_v5  ;;  %v292_v7 = vmul.f32 0.70710677, %v282_v6  ;;  %v290_v11 = vmul.f32 0.5, %v282_v6 }
 0x1f3   :  { %594 = verf.f32 %v292_v7 }
 0x1fe   :  { %v593_v8 = vpop.eup %592 }
 0x1ff   :  { %v297_v10 = vadd.f32 1.0, %v593_v8 }
 0x200   :  { %v595_v9 = vpop.eup %594 }
 0x201   :  { %v296_v12 = vadd.f32 1.0, %v595_v9  ;;  %v299_v15 = vmul.f32 %v297_v10, %v291_v13 }
 0x203   :  { %v298_v14 = vmul.f32 %v296_v12, %v290_v11 }
 0x205   :  { %578 = vmatprep.mubr.f32.mxu0 %v298_v14 }
 0x206   :  { %579 = vmatmul.mubr.f32.vlgmr.msra.gmra.mxu0 %v299_v15 }
 0x2c6   :  { %v580_v17 = vpop.f32.mrf.mxu0 }
 0x2c7   :  { %v395_v18 = vadd.f32 %v580_v17, %v421_v16 }
 0x2c8   :  { %v389_v19 = vpop.f32.mrf.mxu0 }
 0x2c9   :  { %399 = vst [vmem:[#allocation10 + $0x8] sm:$0xff] %v395_v18  ;;  %v390_v20 = vadd.f32 %v421_v16, %v389_v19 }
 0x2cb   :  { %398 = vst [vmem:[#allocation10] sm:$0xff] %v390_v20 }
 0x2cc   :  { %687 = shalt.err (!%p684_p10)
}
 0x2cd   :  { %411 = dma.vmem_to_hbm [thread:$0]  %s406_s24, 256, %s797_s7, [#allocation4], %s706_s29, %s706_s29, %s707_s30  }
 0x2ce   :  { %702 = dma.done.wait [#allocation4], 256  }
 0x2cf   :  { %703 = vsyncadd [#allocation4], 4294967040 }
 0x2d0   :  { %415 = vsyncpa [#allocation3], 1 }
 0x2d1   :  { %416 = vsyncpa [#allocation6], 1 }
 0x2d2   :  { %417 = vsyncpa [#allocation9], 1 }
 0x2d3   :  { %418 = vsyncpa [#allocation4], 1 }

</bundles_post_ra>
